<compile_context>
chip_gen: v5e
topology: v5e:2x2
jax: 0.10.0
libtpu: 0.0.40
codegen_flags: <defaults>
</compile_context>

<pallas_src>
import functools

import jax
import jax.numpy as jnp
from jax import lax
from jax.experimental import pallas as pl
from jax.experimental.pallas import tpu as pltpu


def _round_up(x, m):
    return ((x + m - 1) // m) * m


def _vmem_limit_bytes():
    """~3/4 of physical VMEM per core; conservative fallback if query fails."""
    try:
        cap = pltpu.get_tpu_info().vmem_capacity_bytes
        return min(int(cap * 3 // 4), 112 * 1024 * 1024)
    except Exception:
        return 48 * 1024 * 1024


# --------------------------------------------------------------------------
# Stage 1: (optional LayerNorm) + linear projection, bf16 output.
# --------------------------------------------------------------------------
def _proj_kernel(x_ref, gamma_ref, beta_ref, w_ref, o_ref, *,
                 apply_ln, scale, eps):
    x = x_ref[...].astype(jnp.float32)                       # (tile, dim)
    if apply_ln:
        mu = jnp.mean(x, axis=-1, keepdims=True)
        xc = x - mu
        var = jnp.mean(xc * xc, axis=-1, keepdims=True)
        x = (xc * lax.rsqrt(var + eps)
             * gamma_ref[...].astype(jnp.float32)
             + beta_ref[...].astype(jnp.float32))
    y = jnp.dot(x.astype(jnp.bfloat16), w_ref[...],
                preferred_element_type=jnp.float32)           # (tile, inner)
    if scale != 1.0:
        y = y * scale                                         # fold softmax scale
    o_ref[...] = y.astype(jnp.bfloat16)


def _project(x, gamma, beta, w, *, apply_ln, scale, tile, eps, vmem_limit):
    B, N, dim = x.shape
    inner = w.shape[1]
    kernel = functools.partial(_proj_kernel, apply_ln=apply_ln,
                               scale=scale, eps=eps)
    return pl.pallas_call(
        kernel,
        out_shape=jax.ShapeDtypeStruct((B, N, inner), jnp.bfloat16),
        grid_spec=pltpu.PrefetchScalarGridSpec(
            num_scalar_prefetch=0,
            grid=(B, N // tile),
            in_specs=[
                pl.BlockSpec((pl.Squeezed(), tile, dim),
                             lambda b, i: (b, i, 0)),          # x
                pl.BlockSpec((1, dim), lambda b, i: (0, 0)),   # ln gamma
                pl.BlockSpec((1, dim), lambda b, i: (0, 0)),   # ln beta
                pl.BlockSpec((dim, inner), lambda b, i: (0, 0)),  # W (bf16)
            ],
            out_specs=pl.BlockSpec((pl.Squeezed(), tile, inner),
                                   lambda b, i: (b, i, 0)),
        ),
        compiler_params=pltpu.CompilerParams(
            dimension_semantics=("parallel", "parallel"),
            vmem_limit_bytes=vmem_limit,
        ),
    )(x, gamma, beta, w)


# --------------------------------------------------------------------------
# Stage 2: flash attention over projected Q/K/V + output proj + residual.
# --------------------------------------------------------------------------
def _flash_attn_kernel(q_ref, k_ref, v_ref, wo_ref, bo_ref, xres_ref, o_ref,
                       m_sc, l_sc, acc_sc, *, kv_len, block_kv):
    ki = pl.program_id(2)
    nk = pl.num_programs(2)

    @pl.when(ki == 0)
    def _init():
        m_sc[...] = jnp.full_like(m_sc, -jnp.inf)
        l_sc[...] = jnp.zeros_like(l_sc)
        acc_sc[...] = jnp.zeros_like(acc_sc)

    # s = q @ k^T without an explicit transpose (contract last dims on MXU).
    s = lax.dot_general(q_ref[...], k_ref[...],
                        dimension_numbers=(((1,), (1,)), ((), ())),
                        preferred_element_type=jnp.float32)    # (tq, tk) f32

    if kv_len % block_kv != 0:
        # Only emitted when Nk was padded: mask padded KV columns.
        col = ki * block_kv + lax.broadcasted_iota(jnp.int32, s.shape, 1)
        s = jnp.where(col < kv_len, s, jnp.float32(-jnp.inf))

    m_prev = m_sc[...]
    m_new = jnp.maximum(m_prev, jnp.max(s, axis=-1, keepdims=True))
    alpha = jnp.exp(m_prev - m_new)
    p = jnp.exp(s - m_new)                                     # f32 exp (v5e-safe)
    l_sc[...] = alpha * l_sc[...] + jnp.sum(p, axis=-1, keepdims=True)
    acc_sc[...] = alpha * acc_sc[...] + jnp.dot(
        p.astype(jnp.bfloat16), v_ref[...],
        preferred_element_type=jnp.float32)                    # (tq, inner)
    m_sc[...] = m_new

    @pl.when(ki == nk - 1)
    def _finalize():
        out = acc_sc[...] * pl.reciprocal(l_sc[...], approx=True)   # (tq, inner)
        y = jnp.dot(out.astype(jnp.bfloat16), wo_ref[...],
                    preferred_element_type=jnp.float32)             # (tq, dim)
        y = y + bo_ref[...].astype(jnp.float32) + xres_ref[...].astype(jnp.float32)
        o_ref[...] = y.astype(o_ref.dtype)


def multi_head_attention(input_q, input_k, input_v, params, *, dim_head,
                         block_q=None, block_kv=None, eps=1e-5):
    """input_q: (B, Nq, dim); input_k, input_v: (B, Nk, dim)."""
    B, Nq, dim = input_q.shape
    _, Nk, _ = input_k.shape
    inner_dim = params["wq"].shape[1]
    scale = float(dim_head) ** (-0.5)
    out_dtype = input_q.dtype

    vmem_limit = _vmem_limit_bytes()
    big_vmem = vmem_limit >= 80 * 1024 * 1024        # v5e/v6e (128 MiB physical)
    if block_q is None:
        block_q = 512 if big_vmem else 256
    if block_kv is None:
        block_kv = 512 if big_vmem else 256

    # Tiles are multiples of 8 sublanes; sequence lengths padded to tile
    # multiples (padded KV columns are masked in-kernel, padded Q rows sliced).
    tq = min(_round_up(block_q, 8), _round_up(Nq, 8))
    tk = min(_round_up(block_kv, 8), _round_up(Nk, 8))
    nq_pad = _round_up(Nq, tq)
    nk_pad = _round_up(Nk, tk)

    xq = input_q if nq_pad == Nq else jnp.pad(
        input_q, ((0, 0), (0, nq_pad - Nq), (0, 0)))
    if nk_pad == Nk:
        xk, xv = input_k, input_v
    else:
        xk = jnp.pad(input_k, ((0, 0), (0, nk_pad - Nk), (0, 0)))
        xv = jnp.pad(input_v, ((0, 0), (0, nk_pad - Nk), (0, 0)))

    # bf16 weights (MXU-native, half the resident bytes); LN/bias stay f32.
    wq = params["wq"].astype(jnp.bfloat16)
    wk = params["wk"].astype(jnp.bfloat16)
    wv = params["wv"].astype(jnp.bfloat16)
    wo = params["wo"].astype(jnp.bfloat16)
    gamma = params["ln_gamma"].reshape(1, dim).astype(jnp.float32)
    beta = params["ln_beta"].reshape(1, dim).astype(jnp.float32)
    bo = params["bo"].reshape(1, dim).astype(jnp.float32)

    # ---- Stage 1: hoisted projections (each token LN'd / projected once) ----
    q = _project(xq, gamma, beta, wq, apply_ln=True, scale=scale,
                 tile=tq, eps=eps, vmem_limit=vmem_limit)
    k = _project(xk, gamma, beta, wk, apply_ln=True, scale=1.0,
                 tile=tk, eps=eps, vmem_limit=vmem_limit)
    v = _project(xv, gamma, beta, wv, apply_ln=False, scale=1.0,
                 tile=tk, eps=eps, vmem_limit=vmem_limit)

    # ---- Stage 2: flash attention + output projection + residual ----
    kernel = functools.partial(_flash_attn_kernel, kv_len=Nk, block_kv=tk)

    out = pl.pallas_call(
        kernel,
        out_shape=jax.ShapeDtypeStruct((B, nq_pad, dim), out_dtype),
        grid_spec=pltpu.PrefetchScalarGridSpec(
            num_scalar_prefetch=0,
            grid=(B, nq_pad // tq, nk_pad // tk),     # KV (reduction) axis last
            in_specs=[
                pl.BlockSpec((pl.Squeezed(), tq, inner_dim),
                             lambda b, qi, ki: (b, qi, 0)),            # q (bf16)
                pl.BlockSpec((pl.Squeezed(), tk, inner_dim),
                             lambda b, qi, ki: (b, ki, 0)),            # k (bf16)
                pl.BlockSpec((pl.Squeezed(), tk, inner_dim),
                             lambda b, qi, ki: (b, ki, 0)),            # v (bf16)
                pl.BlockSpec((inner_dim, dim), lambda b, qi, ki: (0, 0)),  # wo
                pl.BlockSpec((1, dim), lambda b, qi, ki: (0, 0)),          # bo
                pl.BlockSpec((pl.Squeezed(), tq, dim),
                             lambda b, qi, ki: (b, qi, 0)),            # residual
            ],
            out_specs=pl.BlockSpec((pl.Squeezed(), tq, dim),
                                   lambda b, qi, ki: (b, qi, 0)),
            scratch_shapes=[
                pltpu.VMEM((tq, 1), jnp.float32),           # running max m
                pltpu.VMEM((tq, 1), jnp.float32),           # running sum l
                pltpu.VMEM((tq, inner_dim), jnp.float32),   # output accumulator
            ],
        ),
        compiler_params=pltpu.CompilerParams(
            # batch + Q-tile axes parallel (feeds both v7x TensorCores),
            # KV reduction axis arbitrary (accumulator semantics).
            dimension_semantics=("parallel", "parallel", "arbitrary"),
            vmem_limit_bytes=vmem_limit,
        ),
    )(q, k, v, wo, bo, xq)

    if nq_pad != Nq:
        out = out[:, :Nq, :]
    return out


def _reference(input_q, input_k, input_v, params, *, dim_head):
    """Pure-JAX reference mirroring the PyTorch forward (f32)."""
    scale = float(dim_head) ** (-0.5)
    gamma = params["ln_gamma"]
    beta = params["ln_beta"]

    def ln(x):
        mu = jnp.mean(x, axis=-1, keepdims=True)
        var = jnp.mean((x - mu) ** 2, axis=-1, keepdims=True)
        return (x - mu) / jnp.sqrt(var + 1e-5) * gamma + beta

    q = ln(input_q) @ params["wq"]
    k = ln(input_k) @ params["wk"]
    v = input_v @ params["wv"]
    dots = jnp.einsum("bqe,bke->bqk", q, k) * scale
    att = jax.nn.softmax(dots, axis=-1)
    out = jnp.einsum("bqk,bke->bqe", att, v)
    return out @ params["wo"] + params["bo"] + input_q


if __name__ == "__main__":
    # Small, module-consistent shapes.  Block sizes force multiple KV tiles so
    # the online-softmax accumulation path is exercised; the second config has
    # non-tile-multiple lengths so the padding / KV-mask path is exercised too.
    dim, heads, dim_head = 32, 2, 16          # inner_dim = 32
    inner_dim = heads * dim_head
    B = 2

    key = jax.random.PRNGKey(0)
    ks = jax.random.split(key, 8)

    params = {
        "ln_gamma": jnp.ones((dim,), jnp.float32),
        "ln_beta": jnp.zeros((dim,), jnp.float32),
        "wq": jax.random.normal(ks[0], (dim, inner_dim), jnp.float32) * 0.1,
        "wk": jax.random.normal(ks[1], (dim, inner_dim), jnp.float32) * 0.1,
        "wv": jax.random.normal(ks[2], (dim, inner_dim), jnp.float32) * 0.1,
        "wo": jax.random.normal(ks[3], (inner_dim, dim), jnp.float32) * 0.1,
        "bo": jax.random.normal(ks[4], (dim,), jnp.float32) * 0.1,
    }

    for (Nq, Nk) in [(64, 64), (72, 80)]:
        kq, kk, kv_ = jax.random.split(jax.random.fold_in(ks[5], Nq * 131 + Nk), 3)
        input_q = jax.random.normal(kq, (B, Nq, dim), jnp.float32)
        input_k = jax.random.normal(kk, (B, Nk, dim), jnp.float32)
        input_v = jax.random.normal(kv_, (B, Nk, dim), jnp.float32)

        out = multi_head_attention(input_q, input_k, input_v, params,
                                   dim_head=dim_head, block_q=32, block_kv=32)
        out = jax.block_until_ready(out)

        ref = _reference(input_q, input_k, input_v, params, dim_head=dim_head)
        assert out.shape == (B, Nq, dim)
        # bf16 MXU operands + approx reciprocal: tolerance loosened accordingly.
        assert jnp.allclose(out, ref, atol=2e-2, rtol=2e-2), \
            (Nq, Nk, float(jnp.max(jnp.abs(out - ref))))

    print("KERNEL_OK")
</pallas_src>

<mosaic_0001>
module attributes {stable_mosaic.version = 11 : i64} {
  func.func @_proj_kernel(%arg0: i32, %arg1: i32, %arg2: memref<1x32x32xf32, #tpu.memory_space<vmem>>, %arg3: memref<1x32xf32, #tpu.memory_space<vmem>>, %arg4: memref<1x32xf32, #tpu.memory_space<vmem>>, %arg5: memref<32x32xbf16, #tpu.memory_space<vmem>>, %arg6: memref<1x32x32xbf16, #tpu.memory_space<vmem>>) attributes {dimension_semantics = [#tpu.dimension_semantics<parallel>, #tpu.dimension_semantics<parallel>], iteration_bounds = array<i64: 2, 2>, scalar_prefetch = 0 : i64, scratch_operands = 0 : i64, tpu.core_type = #tpu.core_type<tc>, window_params = [{transform_indices = @transform_0, window_bounds = array<i64: 1, 32, 32>}, {pipeline_mode = #tpu.pipeline_mode<synchronous>, transform_indices = @transform_1, window_bounds = array<i64: 1, 32>}, {pipeline_mode = #tpu.pipeline_mode<synchronous>, transform_indices = @transform_2, window_bounds = array<i64: 1, 32>}, {pipeline_mode = #tpu.pipeline_mode<synchronous>, transform_indices = @transform_3, window_bounds = array<i64: 32, 32>}, {transform_indices = @transform_4, window_bounds = array<i64: 1, 32, 32>}]} {
    %c0 = arith.constant 0 : index
    %c0_0 = arith.constant 0 : index
    %c0_1 = arith.constant 0 : index
    %0 = vector.load %arg2[%c0, %c0_0, %c0_1] : memref<1x32x32xf32, #tpu.memory_space<vmem>>, vector<1x32x32xf32>
    %1 = vector.shape_cast %0 : vector<1x32x32xf32> to vector<32x32xf32>
    %cst = arith.constant dense<0.000000e+00> : vector<32xf32>
    %2 = vector.multi_reduction <add>, %1, %cst [1] : vector<32x32xf32> to vector<32xf32>
    %3 = vector.shape_cast %2 : vector<32xf32> to vector<32x1xf32>
    %cst_2 = arith.constant 3.200000e+01 : f32
    %4 = vector.broadcast %cst_2 : f32 to vector<32x1xf32>
    %5 = arith.divf %3, %4 : vector<32x1xf32>
    %6 = vector.broadcast %5 : vector<32x1xf32> to vector<32x32xf32>
    %7 = arith.subf %1, %6 : vector<32x32xf32>
    %8 = arith.mulf %7, %7 : vector<32x32xf32>
    %cst_3 = arith.constant dense<0.000000e+00> : vector<32xf32>
    %9 = vector.multi_reduction <add>, %8, %cst_3 [1] : vector<32x32xf32> to vector<32xf32>
    %10 = vector.shape_cast %9 : vector<32xf32> to vector<32x1xf32>
    %cst_4 = arith.constant 3.200000e+01 : f32
    %11 = vector.broadcast %cst_4 : f32 to vector<32x1xf32>
    %12 = arith.divf %10, %11 : vector<32x1xf32>
    %cst_5 = arith.constant 9.99999974E-6 : f32
    %13 = vector.broadcast %cst_5 : f32 to vector<32x1xf32>
    %14 = arith.addf %12, %13 : vector<32x1xf32>
    %15 = math.rsqrt %14 : vector<32x1xf32>
    %16 = vector.broadcast %15 : vector<32x1xf32> to vector<32x32xf32>
    %17 = arith.mulf %7, %16 : vector<32x32xf32>
    %c0_6 = arith.constant 0 : index
    %c0_7 = arith.constant 0 : index
    %18 = vector.load %arg3[%c0_6, %c0_7] : memref<1x32xf32, #tpu.memory_space<vmem>>, vector<1x32xf32>
    %19 = vector.broadcast %18 : vector<1x32xf32> to vector<32x32xf32>
    %20 = arith.mulf %17, %19 : vector<32x32xf32>
    %c0_8 = arith.constant 0 : index
    %c0_9 = arith.constant 0 : index
    %21 = vector.load %arg4[%c0_8, %c0_9] : memref<1x32xf32, #tpu.memory_space<vmem>>, vector<1x32xf32>
    %22 = vector.broadcast %21 : vector<1x32xf32> to vector<32x32xf32>
    %23 = arith.addf %20, %22 : vector<32x32xf32>
    %24 = arith.truncf %23 : vector<32x32xf32> to vector<32x32xbf16>
    %c0_10 = arith.constant 0 : index
    %c0_11 = arith.constant 0 : index
    %25 = vector.load %arg5[%c0_10, %c0_11] : memref<32x32xbf16, #tpu.memory_space<vmem>>, vector<32x32xbf16>
    %cst_12 = arith.constant dense<0.000000e+00> : vector<32x32xf32>
    %26 = tpu.matmul %24, %25, %cst_12 {dimension_numbers = #tpu.dot_dimension_numbers<[1], [0], [0], [1], [0, 0, 1, 1], [], []>} : vector<32x32xbf16>, vector<32x32xbf16>, vector<32x32xf32> -> vector<32x32xf32>
    %cst_13 = arith.constant 2.500000e-01 : f32
    %27 = vector.broadcast %cst_13 : f32 to vector<32x32xf32>
    %28 = arith.mulf %26, %27 : vector<32x32xf32>
    %29 = arith.truncf %28 : vector<32x32xf32> to vector<32x32xbf16>
    %c0_14 = arith.constant 0 : index
    %c0_15 = arith.constant 0 : index
    %c0_16 = arith.constant 0 : index
    %30 = vector.load %arg6[%c0_14, %c0_15, %c0_16] : memref<1x32x32xbf16, #tpu.memory_space<vmem>>, vector<1x32x32xbf16>
    %31 = vector.shape_cast %30 : vector<1x32x32xbf16> to vector<32x32xbf16>
    %32 = vector.shape_cast %29 : vector<32x32xbf16> to vector<1x32x32xbf16>
    tpu.vector_store %arg6[%c0_14, %c0_15, %c0_16], %32 {strides = array<i32>} : memref<1x32x32xbf16, #tpu.memory_space<vmem>>, vector<1x32x32xbf16>,
    return
  }
  func.func @transform_0(%arg0: i32, %arg1: i32) -> (i32, i32, i32) {
    %c0_i32 = arith.constant 0 : i32
    %c0_i32_0 = arith.constant 0 : i32
    return %arg0, %arg1, %c0_i32 : i32, i32, i32
  }
  func.func @transform_1(%arg0: i32, %arg1: i32) -> (i32, i32) {
    %c0_i32 = arith.constant 0 : i32
    %c0_i32_0 = arith.constant 0 : i32
    %c0_i32_1 = arith.constant 0 : i32
    return %c0_i32, %c0_i32_0 : i32, i32
  }
  func.func @transform_2(%arg0: i32, %arg1: i32) -> (i32, i32) {
    %c0_i32 = arith.constant 0 : i32
    %c0_i32_0 = arith.constant 0 : i32
    %c0_i32_1 = arith.constant 0 : i32
    return %c0_i32, %c0_i32_0 : i32, i32
  }
  func.func @transform_3(%arg0: i32, %arg1: i32) -> (i32, i32) {
    %c0_i32 = arith.constant 0 : i32
    %c0_i32_0 = arith.constant 0 : i32
    %c0_i32_1 = arith.constant 0 : i32
    return %c0_i32, %c0_i32_0 : i32, i32
  }
  func.func @transform_4(%arg0: i32, %arg1: i32) -> (i32, i32, i32) {
    %c0_i32 = arith.constant 0 : i32
    %c0_i32_0 = arith.constant 0 : i32
    return %arg0, %arg1, %c0_i32 : i32, i32, i32
  }
}

</mosaic_0001>

<bundles_post_ra>
// kernel: tpu_custom_call.1
= control target key start
LH: loop header
LB: loop body
LE: loop exit
PB: predicated region body
PF: predicated region fallthrough
CT: control target
= control target key end

     0   :  { %s646_s15 = smov 0   ;;  %s648_s16 = smov 0   ;;  %s743_s0 = inlined_call_operand.vmem [shape: f32[2,64,32], index: 0, kind: input, shape index: {}]   ;;  %s744_s1 = inlined_call_operand.vmem [shape: f32[1,32], index: 1, kind: input, shape index: {}]   ;;  %s745_s2 = inlined_call_operand.vmem [shape: f32[1,32], index: 2, kind: input, shape index: {}]   ;;  %s746_s3 = inlined_call_operand.vmem [shape: bf16[32,32], index: 3, kind: input, shape index: {}]   ;;  %s747_s4 = inlined_call_operand.vmem [shape: bf16[2,64,32], index: 4, kind: output, shape index: {}]  }
   0x1   :  { %s650_s17 = smov 0   ;;  %s652_s18 = smov 0  }
   0x2   :  { %s654_s19 = smov 0  }
   0x3 LB: > { %s23_s20 = sadd.s32 1, %s610_s17  ;;  %s26_s21 = sadd.s32 1, %s614_s18  ;;  %s618_s19 = sphi %s654_s19, %s14_s19   ;;  %s614_s18 = sphi %s652_s18, %s751_s18   ;;  %s610_s17 = sphi %s650_s17, %s750_s17   ;;  %s606_s16 = sphi %s648_s16, %s749_s16   ;;  %s602_s15 = sphi %s646_s15, %s748_s15  }
   0x4   : > { %p24_p0 = scmp.ge.s32.totalorder %s23_s20, 2  ;;  %p504_p1 = scmp.ge.s32.totalorder %s618_s19, 1 }
   0x5   : > { %p183_p2 = scmp.lt.s32.totalorder %s618_s19, 5 }
   0x6   : > { %s753_s20 = smov (%p24_p0, %s23_s20), 0  ;;  %s755_s21 = smov (!%p24_p0, %s26_s21), %s614_s18 }
   0x7   : > { %p184_p3 = pnand %p504_p1, %p183_p2  ;;  %p28_p4 = scmp.ge.s32.totalorder %s755_s21, 2 }
   0x8   : > { %s505_s22 = sshll.u32 (!%p184_p3), %s602_s15, 2  ;;  %p218_p5 = scmp.lt.s32.totalorder (!%p184_p3), %s606_s16, 1 }
   0x9   : > { %s757_s21 = smov (%p28_p4, %s755_s21), 0  ;;  %187 = sbr.rel (%p184_p3) target bundleno = 438 (0x1b6), region = 36 }
   0xa   : > { %p220_p6 = scmp.lt.s32.totalorder (!%p184_p3), %s505_s22, 7 }
   0xe   : > { %s759_s16 = smov (!%p218_p5, %s606_s16), 1  ;;  %s761_s22 = smov (!%p220_p6, %s505_s22), 7  ;;  %vm242_vm0 = vcmask 261120   ;;  %v620_v8 = vmov 32.0   ;;  %v524_v35 = vld [vmem:[%s746_s3 + $0x8] sm:$0xff]  ;;  %v523_v40 = vld [vmem:[%s746_s3] sm:$0xff] }
   0xf   : > { %s506_s23 = sshll.u32 %s759_s16, 3  ;;  %570 = vrcp.f32 %v620_v8  ;;  %384 = vmatpush.bf16.msra.mxu0 %v524_v35  ;;  %525 = vmatpush.bf16.msra.mxu1 %v524_v35  ;;  %vm405_vm14 = vcmask 257024  }
  0x10   : > { %s676_s24 = sadd.s32 %s506_s23, %s761_s22 }
  0x11   : > { %s507_s25 = sshll.u32 %s676_s24, 3  ;;  %s510_s11 = sshll.u32 %s676_s24, 2 }
  0x12   : > { %s225_s28 = scalar_lea.vmem %s743_s0, %s507_s25  ;;  %s235_s14 = scalar_lea.vmem %s747_s4, %s510_s11 }
  0x13   : > { %v240_v0 = vld [vmem:[%s225_s28 + $0x10] sm:$0xff]  ;;  %v238_v1 = vld [vmem:[%s225_s28] sm:$0xff]  ;;  %v241_v4 = vld [vmem:[%s225_s28 + $0x18] sm:$0xff]  ;;  %385 = vmatpush.bf16.msra.mxu0 %v523_v40  ;;  %526 = vmatpush.bf16.msra.mxu1 %v523_v40 }
  0x14   : > { %v249_v2 = vsel %vm242_vm0, %v240_v0, 0.0  ;;  %v243_v3 = vsel %vm242_vm0, %v238_v1, 0.0  ;;  %v239_v5 = vld [vmem:[%s225_s28 + $0x8] sm:$0xff]  ;;  %v252_v6 = vsel %vm242_vm0, %v241_v4, 0.0 }
  0x15   : > { %250 = vadd.xlane.f32.xlu1 %v249_v2  ;;  %244 = vadd.xlane.f32.xlu0 %v243_v3  ;;  %v246_v7 = vsel %vm242_vm0, %v239_v5, 0.0  ;;  %v571_v9 = vpop.eup %570 }
  0x16   : > { %v256_v10 = vmul.f32 32.0, %v571_v9  ;;  %vm260_vm1 = vweird.f32 %v571_v9 }
  0x18   : > { %v257_v11 = vsub.f32 1.0, %v256_v10  ;;  %v568_v10 = vld [vmem:[%s744_s1] ss:$0 sm:$0xff] }
  0x1a   : > { %v258_v12 = vmul.f32 %v571_v9, %v257_v11 }
  0x1c   : > { %v259_v13 = vadd.f32 %v571_v9, %v258_v12 }
  0x1d   : > { %253 = vadd.xlane.f32.xlu1 %v252_v6  ;;  %247 = vadd.xlane.f32.xlu0 %v246_v7 }
  0x1e   : > { %v261_v14 = vsel %vm260_vm1, %v571_v9, %v259_v13 }
  0x88   : > { %v251_v15 = vpop.xlane.xlu1 %250  ;;  %v245_v16 = vpop.xlane.xlu0 %244 }
  0x89   : > { %v264_v17 = vmul.f32 %v261_v14, %v251_v15  ;;  %v262_v18 = vmul.f32 %v261_v14, %v245_v16 }
  0x8b   : > { %v686_v19 = vsub.f32 %v240_v0, %v264_v17  ;;  %v688_v20 = vsub.f32 %v238_v1, %v262_v18  ;;  %v569_v17 = vld [vmem:[%s745_s2] ss:$0 sm:$0xff] }
  0x8d   : > { %v272_v21 = vmul.f32 %v686_v19, %v686_v19  ;;  %v270_v22 = vmul.f32 %v688_v20, %v688_v20 }
  0x8f   : > { %v280_v23 = vsel %vm242_vm0, %v272_v21, 0.0  ;;  %v274_v24 = vsel %vm242_vm0, %v270_v22, 0.0 }
  0x90   : > { %v254_v25 = vpop.xlane.xlu1 %253  ;;  %281 = vadd.xlane.f32.xlu0 %v280_v23  ;;  %275 = vadd.xlane.f32.xlu2 %v274_v24  ;;  %v248_v26 = vpop.xlane.xlu0 %247 }
  0x91   : > { %v265_v27 = vmul.f32 %v261_v14, %v254_v25  ;;  %v263_v28 = vmul.f32 %v261_v14, %v248_v26 }
  0x93   : > { %v696_v29 = vsub.f32 %v241_v4, %v265_v27  ;;  %v698_v30 = vsub.f32 %v239_v5, %v263_v28 }
  0x95   : > { %v273_v31 = vmul.f32 %v696_v29, %v696_v29  ;;  %v271_v32 = vmul.f32 %v698_v30, %v698_v30 }
  0x97   : > { %v283_v33 = vsel %vm242_vm0, %v273_v31, 0.0  ;;  %v277_v34 = vsel %vm242_vm0, %v271_v32, 0.0 }
  0x98   : > { %284 = vadd.xlane.f32.xlu1 %v283_v33  ;;  %278 = vadd.xlane.f32.xlu2 %v277_v34 }
 0x103   : > { %v276_v36 = vpop.xlane.xlu2 %275  ;;  %v282_v37 = vpop.xlane.xlu0 %281 }
 0x104   : > { %v286_v38 = vmul.f32 %v276_v36, %v261_v14  ;;  %v288_v39 = vmul.f32 %v282_v37, %v261_v14 }
 0x106   : > { %v290_v41 = vadd.f32 1e-05, %v286_v38  ;;  %v292_v42 = vadd.f32 1e-05, %v288_v39 }
 0x108   : > { %572 = vrsqrt.f32 %v290_v41  ;;  %vm320_vm4 = vweird.f32 %v292_v42  ;;  %vm300_vm5 = vweird.f32 %v290_v41 }
 0x109   : > { %574 = vrsqrt.f32 %v292_v42 }
 0x10b   : > { %v285_v43 = vpop.xlane.xlu1 %284  ;;  %v279_v44 = vpop.xlane.xlu2 %278 }
 0x10c   : > { %v289_v45 = vmul.f32 %v285_v43, %v261_v14  ;;  %v287_v46 = vmul.f32 %v279_v44, %v261_v14 }
 0x10e   : > { %v573_v47 = vpop.eup %572  ;;  %v293_v48 = vadd.f32 1e-05, %v289_v45  ;;  %v291_v49 = vadd.f32 1e-05, %v287_v46 }
 0x10f   : > { %v575_v50 = vpop.eup %574  ;;  %v295_v51 = vmul.f32 %v573_v47, %v290_v41  ;;  %vm301_vm3 = vweird.f32 %v573_v47 }
 0x110   : > { %v315_v52 = vmul.f32 %v575_v50, %v292_v42  ;;  %576 = vrsqrt.f32 %v293_v48  ;;  %vm321_vm2 = vweird.f32 %v575_v50  ;;  %vm302_vm7 = vmor %vm300_vm5, %vm301_vm3  ;;  %vm330_vm10 = vweird.f32 %v293_v48 }
 0x111   : > { %v296_v53 = vmul.f32 %v573_v47, %v295_v51  ;;  %578 = vrsqrt.f32 %v291_v49  ;;  %vm322_vm6 = vmor %vm320_vm4, %vm321_vm2  ;;  %vm310_vm12 = vweird.f32 %v291_v49 }
 0x112   : > { %v316_v54 = vmul.f32 %v575_v50, %v315_v52 }
 0x113   : > { %v297_v55 = vmul.f32 0.5, %v296_v53 }
 0x114   : > { %v317_v56 = vmul.f32 0.5, %v316_v54 }
 0x115   : > { %v298_v57 = vsub.f32 1.5, %v297_v55 }
 0x116   : > { %v577_v58 = vpop.eup %576  ;;  %v318_v59 = vsub.f32 1.5, %v317_v56 }
 0x117   : > { %v579_v60 = vpop.eup %578  ;;  %v325_v61 = vmul.f32 %v577_v58, %v293_v48  ;;  %v299_v62 = vmul.f32 %v573_v47, %v298_v57  ;;  %vm331_vm8 = vweird.f32 %v577_v58 }
 0x118   : > { %v319_v63 = vmul.f32 %v575_v50, %v318_v59  ;;  %v305_v0 = vmul.f32 %v579_v60, %v291_v49  ;;  %vm311_vm9 = vweird.f32 %v579_v60  ;;  %vm332_vm11 = vmor %vm330_vm10, %vm331_vm8 }
 0x119   : > { %v326_v1 = vmul.f32 %v577_v58, %v325_v61  ;;  %v303_v5 = vsel %vm302_vm7, %v573_v47, %v299_v62  ;;  %vm312_vm13 = vmor %vm310_vm12, %vm311_vm9 }
 0x11a   : > { %v306_v2 = vmul.f32 %v579_v60, %v305_v0  ;;  %v323_v3 = vsel %vm322_vm6, %v575_v50, %v319_v63  ;;  %v334_v11 = vmul.f32 %v303_v5, %v688_v20 }
 0x11b   : > { %v327_v4 = vmul.f32 0.5, %v326_v1  ;;  %v336_v8 = vmul.f32 %v323_v3, %v686_v19 }
 0x11c   : > { %v307_v6 = vmul.f32 0.5, %v306_v2  ;;  %v342_v21 = vmul.f32 %v568_v10, %v334_v11 }
 0x11d   : > { %v328_v7 = vsub.f32 1.5, %v327_v4  ;;  %v344_v18 = vmul.f32 %v568_v10, %v336_v8 }
 0x11e   : > { %v308_v9 = vsub.f32 1.5, %v307_v6  ;;  %v350_v25 = vadd.f32 %v569_v17, %v342_v21 }
 0x11f   : > { %v329_v12 = vmul.f32 %v577_v58, %v328_v7  ;;  %v352_v23 = vadd.f32 %v569_v17, %v344_v18 }
 0x120   : > { %v309_v13 = vmul.f32 %v579_v60, %v308_v9 }
 0x121   : > { %v333_v14 = vsel %vm332_vm11, %v577_v58, %v329_v12 }
 0x122   : > { %v337_v15 = vmul.f32 %v333_v14, %v696_v29  ;;  %v313_v16 = vsel %vm312_vm13, %v579_v60, %v309_v13 }
 0x123   : > { %v335_v19 = vmul.f32 %v313_v16, %v698_v30 }
 0x124   : > { %v345_v20 = vmul.f32 %v568_v10, %v337_v15 }
 0x125   : > { %v343_v22 = vmul.f32 %v568_v10, %v335_v19 }
 0x126   : > { %v353_v24 = vadd.f32 %v569_v17, %v345_v20 }
 0x127   : > { %v351_v26 = vadd.f32 %v569_v17, %v343_v22 }
 0x128   : > { %v355_v27 = vpack.c.bf16 %v353_v24, %v352_v23 }
 0x129   : > { %v354_v28 = vpack.c.bf16 %v351_v26, %v350_v25 }
 0x12a   : > { %520 = vmatmul.msk.bf16.vlgmr.msra.gmra.mxu1 %vm242_vm0, %v355_v27 }
 0x12b   : > { %519 = vmatmul.msk.bf16.vlgmr.msra.gmra.mxu0 %vm242_vm0, %v354_v28 }
 0x1a7   : > { %v392_v29 = vpop.f32.mrf.mxu1 }
 0x1a8   : > { %v387_v31 = vpop.f32.mrf.mxu0  ;;  %v399_v32 = vmul.f32 0.25, %v392_v29 }
 0x1a9   : > { %v397_v30 = vmul.f32 0.25, %v387_v31 }
 0x1aa   : > { %v403_v33 = vpack.c.bf16 %v399_v32, %v399_v32 }
 0x1ab   : > { %v401_v34 = vpack.c.bf16 %v397_v30, %v397_v30 }
 0x1ac   : > { %408 = vst.msk [vmem:[%s235_s14 + $0x8] sm:$0xf] %vm405_vm14, %v403_v33 }
 0x1ad   : > { %406 = vst.msk [vmem:[%s235_s14] sm:$0xf] %vm405_vm14, %v401_v34 }
 0x1af   : > { %v394_v35 = vpop.f32.mrf.mxu1 }
 0x1b0   : > { %v389_v36 = vpop.f32.mrf.mxu0  ;;  %v400_v37 = vmul.f32 0.25, %v394_v35 }
 0x1b1   : > { %v398_v38 = vmul.f32 0.25, %v389_v36 }
 0x1b2   : > { %v404_v39 = vpack.c.bf16 %v400_v37, %v400_v37 }
 0x1b3   : > { %v402_v40 = vpack.c.bf16 %v398_v38, %v398_v38 }
 0x1b4   : > { %409 = vst.msk [vmem:[%s235_s14 + $0xc] sm:$0xf] %vm405_vm14, %v404_v39 }
 0x1b5   : > { %407 = vst.msk [vmem:[%s235_s14 + $0x4] sm:$0xf] %vm405_vm14, %v402_v40 }
 0x1b6 PF: > { %s14_s19 = sadd.s32 1, %s618_s19   ;;  %s748_s15 = smov %s610_s17 }
 0x1b7   : > { %p11_p7 = scmp.ge.s32.totalorder %s14_s19, 6   ;;  %s749_s16 = smov %s614_s18 }
 0x1b8   : > { %s750_s17 = smov %s753_s20  ;;  %s751_s18 = smov %s757_s21 }
 0x1b9   :  { %13 = sbr.rel (!%p11_p7) target bundleno = 3 (0x3), region = 66 }

</bundles_post_ra>
